<compile_context>
chip_gen: v5e
topology: v5e:2x2
jax: 0.10.0
libtpu: 0.0.40
codegen_flags: <defaults>
</compile_context>

<pallas_src>
import functools
import itertools

import jax
import jax.numpy as jnp
import numpy as np
from jax.experimental import pallas as pl
from jax.experimental.pallas import tpu as pltpu


def _idct_kernel(x_ref, t_ref, o_ref):
    # x_ref: (tm, 128)  two flattened 8x8 coefficient blocks per row
    # t_ref: (128, 128) block-diagonal fused basis (alpha and 0.25 pre-folded)
    # o_ref: (tm, 128)  spatial-domain output (two blocks per row)
    o_ref[...] = (
        jnp.dot(x_ref[...], t_ref[...], preferred_element_type=jnp.float32) + 128.0
    )


def make_idct_params():
    """Deterministic parameters matching iDCT8x8.__init__ (for the reference)."""
    a = np.array([1.0 / np.sqrt(2)] + [1.0] * 7)
    alpha = np.outer(a, a).astype(np.float32)                       # (8, 8)
    tensor = np.zeros((8, 8, 8, 8), dtype=np.float32)
    for x, y, u, v in itertools.product(range(8), repeat=4):
        tensor[x, y, u, v] = np.cos((2 * u + 1) * x * np.pi / 16) * np.cos(
            (2 * v + 1) * y * np.pi / 16
        )
    return jnp.asarray(alpha), jnp.asarray(tensor)                  # (8,8), (8,8,8,8)


@functools.lru_cache(maxsize=1)
def _fused_basis_default():
    """Cached 128x128 block-diagonal basis with alpha and 0.25 folded in (f64 fold).

    Computed once per process and kept on device; avoids a per-call numpy fold and
    host->device transfer.
    """
    a = np.array([1.0 / np.sqrt(2)] + [1.0] * 7, dtype=np.float64)
    alpha64 = np.outer(a, a).reshape(64)                            # (64,)
    t64 = np.zeros((8, 8, 8, 8), dtype=np.float64)
    for x, y, u, v in itertools.product(range(8), repeat=4):
        t64[x, y, u, v] = np.cos((2 * u + 1) * x * np.pi / 16) * np.cos(
            (2 * v + 1) * y * np.pi / 16
        )
    t_fused = 0.25 * (alpha64[:, None] * t64.reshape(64, 64))       # (64, 64)
    t128 = np.zeros((128, 128), dtype=np.float64)
    t128[:64, :64] = t_fused
    t128[64:, 64:] = t_fused
    return jnp.asarray(t128.astype(np.float32))                     # (128, 128)


@jax.jit
def _fold_basis(alpha, tensor):
    """On-device fold for explicitly supplied (alpha, tensor) parameters."""
    a = alpha.astype(jnp.float32).reshape(64)
    t = tensor.astype(jnp.float32).reshape(64, 64)
    t_fused = 0.25 * (a[:, None] * t)
    z = jnp.zeros((64, 64), jnp.float32)
    top = jnp.concatenate([t_fused, z], axis=1)
    bot = jnp.concatenate([z, t_fused], axis=1)
    return jnp.concatenate([top, bot], axis=0)                      # (128, 128)


def _round_up(x, mult):
    return ((x + mult - 1) // mult) * mult


@functools.partial(jax.jit, static_argnames=("tm_max", "min_steps"))
def _idct8x8_impl(image, t128, *, tm_max=8192, min_steps=8):
    b, n, h, w = image.shape
    assert (h, w) == (8, 8)
    m = b * n

    # Pack two 8x8 blocks per 128-lane row. Pad rows only to a multiple of 8
    # (at most 15 extra rows; usually zero), never up to the tile size.
    m2 = (m + 1) // 2                                   # rows of 128 lanes
    m2p = _round_up(m2, 8)                              # sublane-aligned row count

    # Tile: big enough to amortize per-step pipeline overhead, small enough to keep
    # >= min_steps grid steps (so "parallel" can shard across v7x's two TensorCores)
    # and stay within the scoped-VMEM budget.
    tm_eff = max(8, min(tm_max, _round_up(pl.cdiv(m2p, min_steps), 8)))
    grid = (pl.cdiv(m2p, tm_eff),)                      # partial last block is masked

    x2d = image.reshape(m, 64)
    pad_rows = 2 * m2p - m
    if pad_rows:
        x2d = jnp.pad(x2d, ((0, pad_rows), (0, 0)))
    x128 = x2d.reshape(m2p, 128)

    # ~16 MiB VMEM at tm_eff=8192 (double-buffered in/out) + 128 KiB basis.
    # Raise the scoped limit explicitly (v5e default is 16 MiB); 40 MiB still fits
    # comfortably inside v7x's 64 MiB physical VMEM.
    vmem_limit = 40 * 1024 * 1024

    out128 = pl.pallas_call(
        _idct_kernel,
        out_shape=jax.ShapeDtypeStruct((m2p, 128), jnp.float32),
        grid_spec=pltpu.PrefetchScalarGridSpec(
            num_scalar_prefetch=0,
            grid=grid,
            in_specs=[
                pl.BlockSpec((tm_eff, 128), lambda i: (i, 0)),
                # Constant index_map -> basis is DMA'd once and revisited; the extra
                # 64 KiB of default double-buffering is negligible under the limit.
                pl.BlockSpec((128, 128), lambda i: (0, 0)),
            ],
            out_specs=pl.BlockSpec((tm_eff, 128), lambda i: (i, 0)),
        ),
        compiler_params=pltpu.CompilerParams(
            dimension_semantics=("parallel",),
            vmem_limit_bytes=vmem_limit,
        ),
        cost_estimate=pl.CostEstimate(
            flops=2 * m2p * 128 * 128,
            transcendentals=0,
            bytes_accessed=(m2p * 128 * 2 + 128 * 128) * 4,
        ),
    )(x128, t128)

    out2d = out128.reshape(2 * m2p, 64)[:m]
    return out2d.reshape(b, n, 8, 8)


def idct8x8(image, alpha=None, tensor=None, *, tm_max=8192, min_steps=8):
    """image: (batch, num_blocks, 8, 8) float32 -> same shape (spatial domain + 128)."""
    if alpha is None or tensor is None:
        t128 = _fused_basis_default()          # cached module-level constant
    else:
        t128 = _fold_basis(alpha, tensor)      # tiny on-device fold for custom params
    return _idct8x8_impl(image, t128, tm_max=tm_max, min_steps=min_steps)


def idct8x8_ref(image, alpha, tensor):
    """Pure-JAX reference matching the PyTorch module."""
    x = image * alpha
    res = jnp.tensordot(x, tensor, axes=2)
    return 0.25 * res + 128.0


if __name__ == "__main__":
    key = jax.random.PRNGKey(0)
    alpha, tensor = make_idct_params()

    # Case 1: small, nicely shaped input (default cached basis path).
    batch, num_blocks = 2, 16
    image = jax.random.normal(key, (batch, num_blocks, 8, 8), dtype=jnp.float32) * 50.0
    out = jax.block_until_ready(idct8x8(image))
    ref = jax.block_until_ready(idct8x8_ref(image, alpha, tensor))
    assert out.shape == image.shape
    np.testing.assert_allclose(np.asarray(out), np.asarray(ref), rtol=1e-5, atol=1e-3)

    # Case 2: odd / non-multiple-of-8 block count exercises padding + partial tile,
    # and the explicit-parameters (on-device fold) path.
    key2 = jax.random.PRNGKey(0)
    image2 = jax.random.normal(key2, (3, 7, 8, 8), dtype=jnp.float32) * 50.0
    out2 = jax.block_until_ready(idct8x8(image2, alpha, tensor))
    ref2 = jax.block_until_ready(idct8x8_ref(image2, alpha, tensor))
    assert out2.shape == image2.shape
    np.testing.assert_allclose(np.asarray(out2), np.asarray(ref2), rtol=1e-5, atol=1e-3)

    print("KERNEL_OK")
</pallas_src>

<mosaic_0001>
module attributes {stable_mosaic.version = 11 : i64} {
  func.func @_idct_kernel(%arg0: i32, %arg1: memref<8x128xf32, #tpu.memory_space<vmem>>, %arg2: memref<128x128xf32, #tpu.memory_space<vmem>>, %arg3: memref<8x128xf32, #tpu.memory_space<vmem>>) attributes {dimension_semantics = [#tpu.dimension_semantics<parallel>], iteration_bounds = array<i64: 2>, scalar_prefetch = 0 : i64, scratch_operands = 0 : i64, tpu.core_type = #tpu.core_type<tc>, window_params = [{transform_indices = @transform_0, window_bounds = array<i64: 8, 128>}, {pipeline_mode = #tpu.pipeline_mode<synchronous>, transform_indices = @transform_1, window_bounds = array<i64: 128, 128>}, {transform_indices = @transform_2, window_bounds = array<i64: 8, 128>}]} {
    %c0 = arith.constant 0 : index
    %c0_0 = arith.constant 0 : index
    %0 = vector.load %arg1[%c0, %c0_0] : memref<8x128xf32, #tpu.memory_space<vmem>>, vector<8x128xf32>
    %c0_1 = arith.constant 0 : index
    %c0_2 = arith.constant 0 : index
    %1 = vector.load %arg2[%c0_1, %c0_2] : memref<128x128xf32, #tpu.memory_space<vmem>>, vector<128x128xf32>
    %cst = arith.constant dense<0.000000e+00> : vector<8x128xf32>
    %2 = tpu.matmul %0, %1, %cst {dimension_numbers = #tpu.dot_dimension_numbers<[1], [0], [0], [1], [0, 0, 1, 1], [], []>} : vector<8x128xf32>, vector<128x128xf32>, vector<8x128xf32> -> vector<8x128xf32>
    %cst_3 = arith.constant 1.280000e+02 : f32
    %3 = vector.broadcast %cst_3 : f32 to vector<8x128xf32>
    %4 = arith.addf %2, %3 : vector<8x128xf32>
    %c0_4 = arith.constant 0 : index
    %c0_5 = arith.constant 0 : index
    %5 = vector.load %arg3[%c0_4, %c0_5] : memref<8x128xf32, #tpu.memory_space<vmem>>, vector<8x128xf32>
    tpu.vector_store %arg3[%c0_4, %c0_5], %4 {strides = array<i32>} : memref<8x128xf32, #tpu.memory_space<vmem>>, vector<8x128xf32>,
    return
  }
  func.func @transform_0(%arg0: i32) -> (i32, i32) {
    %c0_i32 = arith.constant 0 : i32
    %c0_i32_0 = arith.constant 0 : i32
    return %arg0, %c0_i32 : i32, i32
  }
  func.func @transform_1(%arg0: i32) -> (i32, i32) {
    %c0_i32 = arith.constant 0 : i32
    %c0_i32_0 = arith.constant 0 : i32
    %c0_i32_1 = arith.constant 0 : i32
    return %c0_i32, %c0_i32_0 : i32, i32
  }
  func.func @transform_2(%arg0: i32) -> (i32, i32) {
    %c0_i32 = arith.constant 0 : i32
    %c0_i32_0 = arith.constant 0 : i32
    return %arg0, %c0_i32 : i32, i32
  }
}

</mosaic_0001>

<bundles_post_ra>
// kernel: _idct8x8_impl.1
= control target key start
LH: loop header
LB: loop body
LE: loop exit
PB: predicated region body
PF: predicated region fallthrough
CT: control target
= control target key end

     0   :  { %s270_s9 = smov 0   ;;  %s335_s0 = inlined_call_operand.vmem [shape: f32[16,128], index: 0, kind: input, shape index: {}]   ;;  %s336_s1 = inlined_call_operand.vmem [shape: f32[128,128], index: 1, kind: input, shape index: {}]   ;;  %s337_s2 = inlined_call_operand.vmem [shape: f32[16,128], index: 2, kind: output, shape index: {}]  }
   0x1 LB: > { %s230_s10 = sadd.s32 4294967295, %s253_s9   ;;  %p234_p0 = scmp.ge.s32.totalorder %s253_s9, 1  ;;  %s253_s9 = sphi %s270_s9, %s12_s9  }
   0x2   : > { %p111_p1 = scmp.lt.s32.totalorder %s253_s9, 3 }
   0x4   : > { %p112_p2 = pnand %p234_p0, %p111_p1 }
   0x5   : > { %p131_p3 = scmp.lt.s32.totalorder (!%p112_p2), %s230_s10, 1 }
   0x6   : > { %115 = sbr.rel (%p112_p2) target bundleno = 172 (0xac), region = 28 }
   0xb   : > { %v155_v0 = vld [vmem:[%s336_s1 + $0x78] sm:$0xff]  ;;  %v154_v1 = vld [vmem:[%s336_s1 + $0x70] sm:$0xff]  ;;  %v153_v2 = vld [vmem:[%s336_s1 + $0x68] sm:$0xff]  ;;  %s339_s10 = smov (!%p131_p3, %s230_s10), 1 }
   0xc   : > { %156 = vmatpush.msra.mxu0 %v155_v0  ;;  %v152_v3 = vld [vmem:[%s336_s1 + $0x60] sm:$0xff]  ;;  %v151_v4 = vld [vmem:[%s336_s1 + $0x58] sm:$0xff]  ;;  %v150_v5 = vld [vmem:[%s336_s1 + $0x50] sm:$0xff]  ;;  %s235_s11 = sshll.u32 %s339_s10, 3 }
   0xd   : > { %v149_v6 = vld [vmem:[%s336_s1 + $0x48] sm:$0xff]  ;;  %v148_v7 = vld [vmem:[%s336_s1 + $0x40] sm:$0xff]  ;;  %v147_v8 = vld [vmem:[%s336_s1 + $0x38] sm:$0xff]  ;;  %s134_s18 = scalar_lea.vmem %s335_s0, %s235_s11  ;;  %s138_s22 = scalar_lea.vmem %s337_s2, %s235_s11 }
   0xe   : > { %157 = vmatpush.msra.mxu0 %v154_v1  ;;  %v146_v9 = vld [vmem:[%s336_s1 + $0x30] sm:$0xff]  ;;  %v145_v10 = vld [vmem:[%s336_s1 + $0x28] sm:$0xff]  ;;  %v144_v11 = vld [vmem:[%s336_s1 + $0x20] sm:$0xff] }
   0xf   : > { %v143_v12 = vld [vmem:[%s336_s1 + $0x18] sm:$0xff]  ;;  %v142_v13 = vld [vmem:[%s336_s1 + $0x10] sm:$0xff]  ;;  %v141_v14 = vld [vmem:[%s336_s1 + $0x8] sm:$0xff] }
  0x10   : > { %158 = vmatpush.msra.mxu0 %v153_v2  ;;  %v140_v15 = vld [vmem:[%s336_s1] sm:$0xff] }
  0x11   : > { %v139_v16 = vld [vmem:[%s134_s18] sm:$0xff] }
  0x12   : > { %159 = vmatpush.msra.mxu0 %v152_v3 }
  0x14   : > { %160 = vmatpush.msra.mxu0 %v151_v4 }
  0x16   : > { %161 = vmatpush.msra.mxu0 %v150_v5 }
  0x18   : > { %162 = vmatpush.msra.mxu0 %v149_v6 }
  0x1a   : > { %163 = vmatpush.msra.mxu0 %v148_v7 }
  0x1c   : > { %164 = vmatpush.msra.mxu0 %v147_v8 }
  0x1e   : > { %165 = vmatpush.msra.mxu0 %v146_v9 }
  0x20   : > { %166 = vmatpush.msra.mxu0 %v145_v10 }
  0x22   : > { %167 = vmatpush.msra.mxu0 %v144_v11 }
  0x24   : > { %168 = vmatpush.msra.mxu0 %v143_v12 }
  0x26   : > { %169 = vmatpush.msra.mxu0 %v142_v13 }
  0x28   : > { %170 = vmatpush.msra.mxu0 %v141_v14 }
  0x2a   : > { %171 = vmatpush.msra.mxu0 %v140_v15 }
  0x2b   : > { %172 = vmatmul.f32.vlgmr.msra.gmra.mxu0 %v139_v16 }
  0xa8   : > { %v173_v17 = vpop.f32.mrf.mxu0 }
  0xa9   : > { %v174_v18 = vadd.f32 128.0, %v173_v17 }
  0xab   : > { %176 = vst [vmem:[%s138_s22] sm:$0xff] %v174_v18 }
  0xac PF: > { %s12_s9 = sadd.s32 1, %s253_s9  }
  0xad   : > { %p9_p4 = scmp.ge.s32.totalorder %s12_s9, 4  }
  0xaf   :  { %11 = sbr.rel (!%p9_p4) target bundleno = 1 (0x1), region = 58 }

</bundles_post_ra>
